<compile_context>
chip_gen: v6e
topology: v6e:2x2x1
jax: 0.10.0
libtpu: 0.0.40
codegen_flags: <defaults>
</compile_context>

<pallas_src>
import functools
import math

import jax
import jax.numpy as jnp
from jax import lax
from jax.experimental import pallas as pl
from jax.experimental.pallas import tpu as pltpu


# --------------------------------------------------------------------------- #
# Helpers
# --------------------------------------------------------------------------- #
def _round_up(x, m):
    return ((x + m - 1) // m) * m


def _round_down(x, m):
    return (x // m) * m


def _sublane_multiple(dtype):
    # Layout-efficient sublane multiple per dtype: f32 -> 8, bf16/f16 -> 16,
    # 8-bit -> 32.
    return {4: 8, 2: 16, 1: 32}.get(jnp.dtype(dtype).itemsize, 8)


def _vmem_capacity_bytes():
    try:
        return int(pltpu.get_tpu_info().vmem_capacity_bytes)
    except Exception:
        return 64 * 1024 * 1024  # conservative default (v7x physical VMEM / TC)


def _target_block_bytes(vmem_bytes):
    # Use ~half of physical VMEM in total: 2 inputs x 2 pipeline buffers plus
    # room for the f32 delta/square intermediates -> divide by 8 per buffer.
    # v7x (64 MiB) -> 4 MiB/buffer, v5e/v6e (128 MiB) -> 8 MiB/buffer.
    return max(512 * 1024, (vmem_bytes // 2) // 8)


def _even_blocks(n, tile, multiple):
    """Shrink `tile` (kept `multiple`-aligned) so cdiv(n, tile) is >= 2 and even
    when possible, so a 'parallel' grid axis splits evenly across v7x's 2 TCs."""
    if n <= multiple:
        return tile
    nb = pl.cdiv(n, tile)
    if nb >= 2 and nb % 2 == 0:
        return tile
    target_nb = 2 if nb < 2 else nb + 1
    new_tile = max(multiple, _round_up(pl.cdiv(n, target_nb), multiple))
    return min(tile, new_tile)


# --------------------------------------------------------------------------- #
# Kernel A: reduction axis on lanes  -- input viewed as (R, D), dim == last
# --------------------------------------------------------------------------- #
def _loss_kernel_lanes(t_ref, p_ref, out_ref, *scratch, n_rows, n_cols,
                       block_rows, block_cols, n_col_blocks):
    i = pl.program_id(0)

    delta = t_ref[...].astype(jnp.float32) - p_ref[...].astype(jnp.float32)
    if n_cols % block_cols != 0:
        # Partial last D block: zero the garbage lanes before squaring.
        j = pl.program_id(1)
        col_ids = j * block_cols + lax.broadcasted_iota(jnp.int32, delta.shape, 1)
        delta = jnp.where(col_ids < n_cols, delta, jnp.float32(0.0))
    sq_sum = jnp.sum(delta * delta, axis=-1, keepdims=True)   # (block_rows, 1)

    def finalize(acc):
        norms = jnp.sqrt(acc)
        if n_rows % block_rows != 0:
            row_ids = i * block_rows + lax.broadcasted_iota(
                jnp.int32, (block_rows, 1), 0)
            norms = jnp.where(row_ids < n_rows, norms, jnp.float32(0.0))
        out_ref[...] = jnp.broadcast_to(jnp.sum(norms), out_ref.shape).astype(
            jnp.float32)

    if n_col_blocks == 1:
        finalize(sq_sum)
    else:
        # Wide reduction axis: accumulate partial sums of squares along the
        # "arbitrary" D grid axis and finalize on the last step.
        (acc_ref,) = scratch
        j = pl.program_id(1)

        @pl.when(j == 0)
        def _():
            acc_ref[...] = jnp.zeros_like(acc_ref)

        acc_ref[...] += sq_sum

        @pl.when(j == n_col_blocks - 1)
        def _():
            finalize(acc_ref[...])


def _loss_lanes(t2, p2, n_valid_rows, block_bytes):
    n_rows_arr, n_cols = t2.shape
    dtype = t2.dtype
    itemsize = jnp.dtype(dtype).itemsize
    sub = _sublane_multiple(dtype)
    vmem_bytes = _vmem_capacity_bytes()

    d_pad = _round_up(n_cols, 128)
    if sub * d_pad * itemsize <= block_bytes:
        td = n_cols                                   # whole reduction axis
        tr = max(sub, _round_down(block_bytes // (d_pad * itemsize), sub))
    else:
        tr = sub                                      # tile D, accumulate
        td = max(128, _round_down(block_bytes // (sub * itemsize), 128))
        td = min(td, d_pad)
    tr = min(tr, max(sub, _round_down(n_rows_arr, sub)))
    tr = _even_blocks(n_valid_rows, tr, sub)

    n_row_blocks = pl.cdiv(n_valid_rows, tr)
    n_col_blocks = pl.cdiv(n_cols, td)

    # VMEM footprint: lane-padded input blocks (double-buffered) + f32 temps.
    td_pad = _round_up(td, 128)
    in_block = tr * td_pad * itemsize
    f32_block = tr * td_pad * 4
    acc_bytes = tr * 128 * 4 if n_col_blocks > 1 else 0
    footprint = 4 * in_block + 2 * f32_block + acc_bytes + 2 * 8 * 128 * 4
    vmem_limit = int(min(vmem_bytes, max(footprint + (4 << 20), 16 << 20)))

    kernel = functools.partial(
        _loss_kernel_lanes, n_rows=n_valid_rows, n_cols=n_cols,
        block_rows=tr, block_cols=td, n_col_blocks=n_col_blocks)

    scratch = [pltpu.VMEM((tr, 1), jnp.float32)] if n_col_blocks > 1 else []

    cost = pl.CostEstimate(
        flops=3 * n_valid_rows * n_cols,
        transcendentals=n_valid_rows,
        bytes_accessed=2 * n_valid_rows * n_cols * itemsize
        + n_row_blocks * 8 * 128 * 4)

    partials = pl.pallas_call(
        kernel,
        out_shape=jax.ShapeDtypeStruct((n_row_blocks * 8, 128), jnp.float32),
        grid_spec=pltpu.PrefetchScalarGridSpec(
            num_scalar_prefetch=0,
            grid=(n_row_blocks, n_col_blocks),
            in_specs=[
                pl.BlockSpec((tr, td), lambda i, j: (i, j)),
                pl.BlockSpec((tr, td), lambda i, j: (i, j)),
            ],
            out_specs=pl.BlockSpec((8, 128), lambda i, j: (i, 0)),
            scratch_shapes=scratch,
        ),
        compiler_params=pltpu.CompilerParams(
            dimension_semantics=("parallel", "arbitrary"),
            vmem_limit_bytes=vmem_limit,
        ),
        cost_estimate=cost,
    )(t2, p2)

    per_block = partials.reshape(n_row_blocks, 8, 128)[:, 0, 0]
    return jnp.sum(per_block)


# --------------------------------------------------------------------------- #
# Kernel B: reduction axis on sublanes -- input viewed as (P, D, Q), dim middle
# (no HBM transpose; original layout is kept, Q = flattened trailing dims)
# --------------------------------------------------------------------------- #
def _loss_kernel_sublanes(t_ref, p_ref, out_ref, *, n_p, n_q, block_p, block_q):
    delta = t_ref[...].astype(jnp.float32) - p_ref[...].astype(jnp.float32)
    norms = jnp.sqrt(jnp.sum(delta * delta, axis=1))          # (block_p, block_q)

    mask = None
    if n_p % block_p != 0:
        p_ids = pl.program_id(0) * block_p + lax.broadcasted_iota(
            jnp.int32, (block_p, block_q), 0)
        mask = p_ids < n_p
    if n_q % block_q != 0:
        q_ids = pl.program_id(1) * block_q + lax.broadcasted_iota(
            jnp.int32, (block_p, block_q), 1)
        qmask = q_ids < n_q
        mask = qmask if mask is None else jnp.logical_and(mask, qmask)
    if mask is not None:
        norms = jnp.where(mask, norms, jnp.float32(0.0))

    out_ref[...] = jnp.broadcast_to(jnp.sum(norms), out_ref.shape).astype(
        jnp.float32)


def _loss_sublanes(t3, p3, block_bytes):
    P, D, Q = t3.shape
    dtype = t3.dtype
    itemsize = jnp.dtype(dtype).itemsize
    sub = _sublane_multiple(dtype)
    vmem_bytes = _vmem_capacity_bytes()

    d_pad = _round_up(D, sub)
    q_pad = _round_up(Q, 128)
    slab_bytes = d_pad * q_pad * itemsize           # one p-row, padded (D, Q)

    if slab_bytes <= block_bytes:
        tq = Q
        tp = max(1, min(P, block_bytes // slab_bytes))
    else:
        tp = 1
        tq = max(128, _round_down(block_bytes // (d_pad * itemsize), 128))
        tq = min(tq, _round_down(Q, 128))

    n_p = pl.cdiv(P, tp)
    n_q = pl.cdiv(Q, tq)
    if (n_p * n_q) % 2 == 1:                        # single block or odd split
        if P > 1:
            tp = _even_blocks(P, tp, 1)
        elif Q > 128:
            tq = min(tq, _round_up(pl.cdiv(Q, 2), 128))
        n_p = pl.cdiv(P, tp)
        n_q = pl.cdiv(Q, tq)

    tq_pad = _round_up(tq, 128)
    in_block = tp * d_pad * tq_pad * itemsize
    f32_block = tp * _round_up(D, 8) * tq_pad * 4
    footprint = 4 * in_block + 2 * f32_block + 2 * 8 * 128 * 4
    vmem_limit = int(min(vmem_bytes, max(footprint + (4 << 20), 16 << 20)))

    kernel = functools.partial(_loss_kernel_sublanes,
                               n_p=P, n_q=Q, block_p=tp, block_q=tq)

    cost = pl.CostEstimate(
        flops=3 * P * D * Q,
        transcendentals=P * Q,
        bytes_accessed=2 * P * D * Q * itemsize + n_p * n_q * 8 * 128 * 4)

    partials = pl.pallas_call(
        kernel,
        out_shape=jax.ShapeDtypeStruct((n_p * 8, n_q * 128), jnp.float32),
        grid_spec=pltpu.PrefetchScalarGridSpec(
            num_scalar_prefetch=0,
            grid=(n_p, n_q),
            in_specs=[
                pl.BlockSpec((tp, D, tq), lambda i, j: (i, 0, j)),
                pl.BlockSpec((tp, D, tq), lambda i, j: (i, 0, j)),
            ],
            out_specs=pl.BlockSpec((8, 128), lambda i, j: (i, j)),
        ),
        compiler_params=pltpu.CompilerParams(
            dimension_semantics=("parallel", "parallel"),
            vmem_limit_bytes=vmem_limit,
        ),
        cost_estimate=cost,
    )(t3, p3)

    per_block = partials.reshape(n_p, 8, n_q, 128)[:, 0, :, 0]
    return jnp.sum(per_block)


# --------------------------------------------------------------------------- #
# Public wrapper (matches torch.norm(target - pred, dim=dim).mean())
# --------------------------------------------------------------------------- #
def euclidean_loss(target, pred, dim, *, block_bytes=None):
    assert target.shape == pred.shape, "target/pred must have identical shapes"
    ndim = target.ndim
    dim = dim % ndim
    shape = target.shape
    dtype = target.dtype
    itemsize = jnp.dtype(dtype).itemsize
    sub = _sublane_multiple(dtype)
    bb = block_bytes if block_bytes is not None else _target_block_bytes(
        _vmem_capacity_bytes())

    if dim == ndim - 1:
        # Reduction axis already last: free reshape, reduction on lanes.
        # TODO(synk): for D << 128 the lane axis is mostly padding; a lane-dense
        # repack (rows on lanes) would recover up to 128/D bandwidth.
        D = shape[-1]
        R = int(math.prod(shape[:-1])) if ndim > 1 else 1
        t2 = target.reshape(R, D)
        p2 = pred.reshape(R, D)
        if R < sub:   # pad a few zero rows so the single block stays in-bounds
            t2 = jnp.pad(t2, ((0, sub - R), (0, 0)))
            p2 = jnp.pad(p2, ((0, sub - R), (0, 0)))
        total = _loss_lanes(t2, p2, R, bb)
        count = R
    else:
        # Reduction over a leading/middle axis: keep the original HBM layout
        # (no transpose) and reduce over the sublane axis of (P, D, Q) blocks.
        P = int(math.prod(shape[:dim])) if dim > 0 else 1
        D = shape[dim]
        Q = int(math.prod(shape[dim + 1:]))
        count = P * Q
        min_block = _round_up(D, sub) * 128 * itemsize
        if min_block <= bb:
            t3 = target.reshape(P, D, Q)
            p3 = pred.reshape(P, D, Q)
            total = _loss_sublanes(t3, p3, bb)
        else:
            # TODO(synk): extremely wide middle reduction axis — fall back to a
            # one-off HBM transpose + the lane-layout path with D tiling instead
            # of expressing the permutation in the index_map.
            perm = tuple(a for a in range(ndim) if a != dim) + (dim,)
            t2 = jnp.transpose(target, perm).reshape(count, D)
            p2 = jnp.transpose(pred, perm).reshape(count, D)
            if count < sub:
                t2 = jnp.pad(t2, ((0, sub - count), (0, 0)))
                p2 = jnp.pad(p2, ((0, sub - count), (0, 0)))
            total = _loss_lanes(t2, p2, count, bb)

    return total / jnp.float32(count)


# --------------------------------------------------------------------------- #
# Self-test
# --------------------------------------------------------------------------- #
if __name__ == "__main__":
    key = jax.random.PRNGKey(0)

    def reference(target, pred, dim):
        d = target.astype(jnp.float32) - pred.astype(jnp.float32)
        return jnp.mean(jnp.sqrt(jnp.sum(d * d, axis=dim)))

    cases = [
        # (shape, dim, dtype, block_bytes_override)
        ((2, 8, 128), -1, jnp.float32, None),     # lanes path, even 2-block split
        ((3, 100, 128), -1, jnp.float32, None),   # partial last row block (mask)
        ((2, 4, 16, 16), 1, jnp.float32, None),   # middle-axis reduce, no transpose
        ((4, 20, 64), 1, jnp.float32, None),      # small-D middle axis, Q on lanes
        ((16, 384), -1, jnp.float32, 8192),       # forces D tiling + accumulator
        ((2, 8, 128), -1, jnp.bfloat16, None),    # dtype-aware (16-row) sublane tile
    ]
    for shape, dim, dtype, bb in cases:
        key, k1, k2 = jax.random.split(key, 3)
        target = jax.random.normal(k1, shape, dtype=jnp.float32).astype(dtype)
        pred = jax.random.normal(k2, shape, dtype=jnp.float32).astype(dtype)
        loss = jax.block_until_ready(
            euclidean_loss(target, pred, dim, block_bytes=bb))
        ref = reference(target, pred, dim)
        assert jnp.allclose(loss, ref, rtol=1e-4, atol=1e-5), (
            shape, dim, dtype, loss, ref)

    print("KERNEL_OK")
</pallas_src>

<mosaic_0001>
module attributes {stable_mosaic.version = 11 : i64} {
  func.func @_loss_kernel_lanes(%arg0: i32, %arg1: i32, %arg2: memref<8x128xf32, #tpu.memory_space<vmem>>, %arg3: memref<8x128xf32, #tpu.memory_space<vmem>>, %arg4: memref<8x128xf32, #tpu.memory_space<vmem>>) attributes {dimension_semantics = [#tpu.dimension_semantics<parallel>, #tpu.dimension_semantics<arbitrary>], iteration_bounds = array<i64: 2, 1>, scalar_prefetch = 0 : i64, scratch_operands = 0 : i64, tpu.core_type = #tpu.core_type<tc>, window_params = [{transform_indices = @transform_0, window_bounds = array<i64: 8, 128>}, {transform_indices = @transform_1, window_bounds = array<i64: 8, 128>}, {transform_indices = @transform_2, window_bounds = array<i64: 8, 128>}]} {
    %c0 = arith.constant 0 : index
    %c0_0 = arith.constant 0 : index
    %0 = vector.load %arg2[%c0, %c0_0] : memref<8x128xf32, #tpu.memory_space<vmem>>, vector<8x128xf32>
    %c0_1 = arith.constant 0 : index
    %c0_2 = arith.constant 0 : index
    %1 = vector.load %arg3[%c0_1, %c0_2] : memref<8x128xf32, #tpu.memory_space<vmem>>, vector<8x128xf32>
    %2 = arith.subf %0, %1 : vector<8x128xf32>
    %3 = arith.mulf %2, %2 : vector<8x128xf32>
    %cst = arith.constant dense<0.000000e+00> : vector<8xf32>
    %4 = vector.multi_reduction <add>, %3, %cst [1] : vector<8x128xf32> to vector<8xf32>
    %5 = vector.shape_cast %4 : vector<8xf32> to vector<8x1xf32>
    %6 = math.sqrt %5 : vector<8x1xf32>
    %7 = vector.shape_cast %6 : vector<8x1xf32> to vector<1x8x1xf32>
    %cst_3 = arith.constant dense<0.000000e+00> : vector<1xf32>
    %8 = vector.multi_reduction <add>, %7, %cst_3 [1, 2] : vector<1x8x1xf32> to vector<1xf32>
    %9 = vector.shape_cast %8 : vector<1xf32> to vector<1x1x1xf32>
    %10 = vector.extract %9[0, 0, 0] : f32 from vector<1x1x1xf32>
    %11 = vector.broadcast %10 : f32 to vector<8x128xf32>
    %c0_4 = arith.constant 0 : index
    %c0_5 = arith.constant 0 : index
    %12 = vector.load %arg4[%c0_4, %c0_5] : memref<8x128xf32, #tpu.memory_space<vmem>>, vector<8x128xf32>
    tpu.vector_store %arg4[%c0_4, %c0_5], %11 {strides = array<i32>} : memref<8x128xf32, #tpu.memory_space<vmem>>, vector<8x128xf32>,
    return
  }
  func.func @transform_0(%arg0: i32, %arg1: i32) -> (i32, i32) {
    %c0_i32 = arith.constant 0 : i32
    return %arg0, %arg1 : i32, i32
  }
  func.func @transform_1(%arg0: i32, %arg1: i32) -> (i32, i32) {
    %c0_i32 = arith.constant 0 : i32
    return %arg0, %arg1 : i32, i32
  }
  func.func @transform_2(%arg0: i32, %arg1: i32) -> (i32, i32) {
    %c0_i32 = arith.constant 0 : i32
    %c0_i32_0 = arith.constant 0 : i32
    return %arg0, %c0_i32 : i32, i32
  }
}

</mosaic_0001>

<bundles_post_ra>
// kernel: tpu_custom_call.1
= control target key start
LH: loop header
LB: loop body
LE: loop exit
PB: predicated region body
PF: predicated region fallthrough
CT: control target
= control target key end

     0   :  { %7 = vsyncpa [#allocation3], 0  ;;  %s773_s0 = inlined_call_operand.hbm [shape: f32[16,128], index: 0, kind: input, shape index: {}]   ;;  %s774_s1 = inlined_call_operand.hbm [shape: f32[16,128], index: 1, kind: input, shape index: {}]   ;;  %s775_s2 = inlined_call_operand.hbm [shape: f32[16,128], index: 2, kind: output, shape index: {}]  }
   0x1   :  { %9 = vsyncpa [#allocation3 + $0x1], 0 }
   0x2   :  { %10 = vsyncpa [#allocation6], 0 }
   0x3   :  { %12 = vsyncpa [#allocation6 + $0x1], 0 }
   0x4   :  { %13 = vsyncpa [#allocation4], 0 }
   0x5   :  { %15 = vsyncpa [#allocation4 + $0x1], 0  ;;  %s601_s9 = smov 0   ;;  %s603_s10 = smov 0  }
   0x6   :  { %s605_s11 = smov 0   ;;  %s607_s12 = smov 0  }
   0x7   :  { %s609_s13 = smov 0   ;;  %s611_s14 = smov 0  }
   0x8 LB: > { %s354_s15 = sadd.s32 4294967295, %s581_s14   ;;  %s355_s16 = sadd.s32 4294967294, %s581_s14   ;;  %s581_s14 = sphi %s611_s14, %s21_s14   ;;  %s577_s13 = sphi %s609_s13, %s787_s13   ;;  %s573_s12 = sphi %s607_s12, %s786_s12   ;;  %s569_s11 = sphi %s605_s11, %s785_s11   ;;  %s565_s10 = sphi %s603_s10, %s784_s10   ;;  %s561_s9 = sphi %s601_s9, %s783_s9  }
   0x9   : > { %s33_s17 = sadd.s32 1, %s577_s13  ;;  %s42_s18 = sadd.s32 1, %s569_s11 }
   0xa   : > { %p35_p0 = scmp.ge.s32.totalorder %s33_s17, 2  ;;  %p49_p1 = scmp.ne.s32.totalorder %s569_s11, %s565_s10 }
   0xb   : > { %p50_p2 = scmp.eq.s32.totalorder %s581_s14, 0  ;;  %p55_p3 = scmp.ne.s32.totalorder %s565_s10, %s561_s9 }
   0xc   : > { %s789_s17 = smov (%p35_p0, %s33_s17), 0  ;;  %p56_p5 = scmp.eq.s32.totalorder %s354_s15, 0 }
   0xd   : > { %p642_p4 = por %p50_p2, %p49_p1  ;;  %s37_s20 = ssub.s32 %s577_s13, %s789_s17 }
   0xe   : > { %p107_p6 = scmp.eq.s32.totalorder %s354_s15, 1  ;;  %p40_p7 = scmp.eq.s32.totalorder %s37_s20, 0 }
   0xf   : > { %p648_p8 = por %p56_p5, %p55_p3  ;;  %p113_p10 = scmp.eq.s32.totalorder %s355_s16, 1 }
  0x10   : > { %p652_p9 = por %p107_p6, %p49_p1  ;;  %p389_p13 = scmp.lt.s32.totalorder %s581_s14, 2 }
  0x11   : > { %s657_s23 = scalar_select %p40_p7, %s569_s11, %s42_s18  }
  0x12   : > { %p659_p11 = por %p113_p10, %p55_p3  ;;  %s666_s25 = sand.u32 1, %s569_s11  }
  0x13   : > { %s358_s26 = sshll.u32 %s666_s25, 3  ;;  %s359_s27 = sshll.u32 %s577_s13, 7 }
  0x14   : > { %s143_s30 = scalar_lea.hbm %s773_s0, %s359_s27  ;;  %s137_s3 = scalar_lea.vmem [#allocation2], %s358_s26 }
  0x15   : > { %s145_s4 = sshll.u32 %s137_s3, 4  ;;  %p675_p0 = pnand %p389_p13, %p642_p4  ;;  %s146_s4 = int_to_ptr.vmem [resolvable:$true] %s145_s4 }
  0x16   : > { %p362_p1 = scmp.ge.s32.totalorder %s581_s14, 1  ;;  %p169_p2 = scmp.lt.s32.totalorder %s581_s14, 3 }
  0x17   : > { %s134_s6 = scalar_lea.sflag [#allocation3], %s666_s25  ;;  %p443_p3 = pneg %p675_p0 }
  0x18   : > { %s454_s7 = scalar_lea.vmem %s146_s4, 128  ;;  %s583_s8 = smov [#allocation2]  }
  0x19   : > { %p455_p5 = scmp.ne.s32.totalorder %s146_s4, %s454_s7  ;;  %s459_s15 = sshll.u32 %s583_s8, 4  ;;  %s460_s15 = int_to_ptr.vmem [resolvable:$false] %s459_s15 }
  0x1a   : > { %s461_s16 = scalar_lea.vmem %s460_s15, 256  ;;  %p462_p4 = scmp.lt.s32.totalorder %s146_s4, %s460_s15 }
  0x1b   : > { %p457_p6 = pnand %p455_p5, %p443_p3  ;;  %p463_p10 = scmp.lt.s32.totalorder %s461_s16, %s454_s7 }
  0x1d   : > { %p458_p7 = pneg %p457_p6  ;;  %p464_p13 = por %p463_p10, %p462_p4 }
  0x1f   : > { %p465_p12 = pnand %p464_p13, %p458_p7 }
  0x21   : > { %468 = shalt.err (!%p465_p12)
}
  0x22   : > { %381 = dma.hbm_to_vmem [thread:$0]  (!%p675_p0), %s143_s30, 128, %s146_s4, %s134_s6  }
  0x23   : > { %p693_p5 = pnand %p362_p1, %p169_p2  ;;  %s162_s28 = scalar_lea.hbm %s774_s1, %s359_s27 }
  0x24   : > { %s156_s29 = scalar_lea.vmem [#allocation5], %s358_s26  ;;  %s153_s7 = scalar_lea.sflag [#allocation6], %s666_s25 }
  0x25   : > { %s164_s3 = sshll.u32 %s156_s29, 4  ;;  %s584_s30 = smov [#allocation5]   ;;  %s165_s3 = int_to_ptr.vmem [resolvable:$true] %s164_s3 }
  0x26   : > { %s482_s8 = scalar_lea.vmem %s165_s3, 128  ;;  %s487_s4 = sshll.u32 %s584_s30, 4  ;;  %s488_s4 = int_to_ptr.vmem [resolvable:$false] %s487_s4 }
  0x27   : > { %p483_p12 = scmp.ne.s32.totalorder %s165_s3, %s482_s8  ;;  %s489_s6 = scalar_lea.vmem %s488_s4, 256 }
  0x28   : > { %p490_p1 = scmp.lt.s32.totalorder %s165_s3, %s488_s4  ;;  %p491_p2 = scmp.lt.s32.totalorder %s489_s6, %s482_s8 }
  0x29   : > { %p485_p6 = pnand %p483_p12, %p443_p3 }
  0x2a   : > { %p492_p4 = por %p491_p2, %p490_p1 }
  0x2b   : > { %p486_p7 = pneg %p485_p6 }
  0x2d   : > { %p493_p10 = pnand %p492_p4, %p486_p7 }
  0x2f   : > { %496 = shalt.err (!%p493_p10)
}
  0x30   : > { %384 = dma.hbm_to_vmem [thread:$0]  (!%p675_p0), %s162_s28, 128, %s165_s3, %s153_s7  }
  0x31   : > { %173 = sbr.rel (%p693_p5) target bundleno = 433 (0x1b1), region = 28  ;;  %s709_s25 = sand.u32 (!%p693_p5), 1, %s565_s10  }
  0x32   : > { %s712_s26 = sshll.u32 (!%p693_p5), %s709_s25, 3  ;;  %s176_s27 = scalar_lea.sflag (!%p693_p5), [#allocation3], %s709_s25 }
  0x33   : > { %s179_s15 = scalar_lea.vmem (!%p693_p5), [#allocation2], %s712_s26 }
  0x36   : > { %548 = dma.done.wait (%p648_p8), %s176_s27, 128  }
  0x37   : > { %550 = vsyncadd (%p648_p8), %s176_s27, 4294967168  ;;  %s185_s5 = scalar_lea.sflag [#allocation6], %s709_s25  ;;  %s188_s16 = scalar_lea.vmem [#allocation5], %s712_s26 }
  0x38   : > { %552 = dma.done.wait (%p648_p8), %s185_s5, 128  }
  0x39   : > { %554 = vsyncadd (%p648_p8), %s185_s5, 4294967168  ;;  %v214_v0 = vld [vmem:[%s179_s15] sm:$0xff]  ;;  %v215_v1 = vld [vmem:[%s188_s16] sm:$0xff]  ;;  %vm227_vm1 = vcmask 7168   ;;  %s213_s21 = scalar_lea.vmem [#allocation7], %s712_s26  ;;  %s367_s19 = sshll.u32 %s573_s12, 7 }
  0x3a   : > { %v216_v2 = vsub.f32 %v214_v0, %v215_v1  ;;  %s254_s18 = sshll.u32 %s213_s21, 4  ;;  %s252_s3 = scalar_lea.hbm %s775_s2, %s367_s19  ;;  %s728_s18 = int_to_ptr.vmem [resolvable:$true] %s254_s18 }
  0x3b   : > { %s241_s7 = scalar_lea.sflag [#allocation4], %s709_s25  ;;  %s497_s8 = scalar_lea.vmem %s728_s18, 128 }
  0x3c   : > { %v217_v3 = vmul.f32 %v216_v2, %v216_v2  ;;  %p498_p8 = scmp.ne.s32.totalorder %s728_s18, %s497_s8  ;;  %s585_s30 = smov [#allocation7]  }
  0x3d   : > { %s501_s12 = sshll.u32 %s585_s30, 4  ;;  %s502_s12 = int_to_ptr.vmem [resolvable:$false] %s501_s12 }
  0x3e   : > { %218 = vadd.xlane.f32.xlu0 %v217_v3  ;;  %p499_p0 = pnand %p498_p8, %p652_p9  ;;  %s503_s4 = scalar_lea.vmem %s502_s12, 256 }
  0x3f   : > { %p504_p13 = scmp.lt.s32.totalorder %s728_s18, %s502_s12  ;;  %p505_p5 = scmp.lt.s32.totalorder %s503_s4, %s497_s8 }
  0x40   : > { %p500_p3 = pneg %p499_p0 }
  0x41   : > { %p506_p12 = por %p505_p5, %p504_p13 }
  0x43   : > { %p507_p6 = pnand %p506_p12, %p500_p3 }
  0xc7   : > { %v219_v4 = vpop.xlane.xlu0 %218 }
  0xc8   : > { %439 = vrsqrt.f32 %v219_v4  ;;  %vm222_vm0 = vcmp.eq.f32.partialorder %v219_v4, inf  ;;  %v225_v7 = vand.u32 2147483648, %v219_v4  ;;  %vm224_vm2 = vcmp.eq.f32.partialorder %v219_v4, 0.0 }
  0xd5   : > { %v440_v5 = vpop.eup %439 }
  0xd6   : > { %v221_v6 = vmul.f32 %v440_v5, %v219_v4 }
  0xd8   : > { %v223_v8 = vsel %vm222_vm0, %v219_v4, %v221_v6 }
  0xd9   : > { %v226_v9 = vsel %vm224_vm2, %v225_v7, %v223_v8 }
  0xda   : > { %v228_v10 = vsel %vm227_vm1, %v226_v9, 0.0 }
  0xdb   : > { %229 = vadd.xlane.f32.xlu0 %v228_v10 }
 0x164   : > { %v230_v11 = vpop.xlane.xlu0 %229 }
 0x165   : > { %v231_v12 = vrot.slane %v230_v11, 4 }
 0x167   : > { %v232_v13 = vadd.f32 %v231_v12, %v230_v11 }
 0x169   : > { %v233_v14 = vrot.slane %v232_v13, 2 }
 0x16b   : > { %v234_v15 = vadd.f32 %v233_v14, %v232_v13 }
 0x16d   : > { %v235_v16 = vrot.slane %v234_v15, 1 }
 0x16f   : > { %v236_v17 = vadd.f32 %v235_v16, %v234_v15 }
 0x171   : > { %370 = vpush %v236_v17 }
 0x1a2   : > { %s371_s20 = spop %370 }
 0x1a3   : > { %v238_v18 = vstv %s371_s20 }
 0x1a4   : > { %239 = vst [vmem:[%s213_s21] sm:$0xff] %v238_v18 }
 0x1a5   : > { %510 = shalt.err (!%p507_p6)
}
 0x1a6   : > { %s511_s6 = scalar_lea.hbm %s252_s3, 128  ;;  %s515_s27 = scalar_lea.hbm %s775_s2, 256 }
 0x1a7   : > { %p512_p7 = scmp.ne.s32.totalorder %s252_s3, %s511_s6  ;;  %p516_p4 = scmp.lt.s32.totalorder %s252_s3, %s775_s2 }
 0x1a8   : > { %p517_p10 = scmp.lt.s32.totalorder %s515_s27, %s511_s6 }
 0x1a9   : > { %p513_p1 = pnand %p512_p7, %p652_p9 }
 0x1aa   : > { %p518_p8 = por %p517_p10, %p516_p4 }
 0x1ab   : > { %p514_p2 = pneg %p513_p1 }
 0x1ad   : > { %p519_p0 = pnand %p518_p8, %p514_p2 }
 0x1af   : > { %522 = shalt.err (!%p519_p0)
}
 0x1b0   : > { %376 = dma.vmem_to_hbm [thread:$0]  (%p652_p9), %s728_s18, 128, %s252_s3, %s241_s7  }
 0x1b1 PF: > { %s266_s16 = sand.u32 1, %s561_s9   ;;  %p782_p3 = scmp.ge.s32.totalorder %s581_s14, 2 }
 0x1b2   : > { %s267_s21 = scalar_lea.sflag [#allocation4], %s266_s16 }
 0x1b3   : > { %p386_p13 = pnand %p782_p3, %p659_p11 }
 0x1b5   : > { %p387_p5 = pneg %p386_p13 }
 0x1b7   : > { %556 = dma.done.wait (%p387_p5), %s267_s21, 128  }
 0x1b8   : > { %558 = vsyncadd (%p387_p5), %s267_s21, 4294967168  ;;  %s21_s14 = sadd.s32 1, %s581_s14   ;;  %s783_s9 = smov %s565_s10 }
 0x1b9   : > { %p18_p12 = scmp.ge.s32.totalorder %s21_s14, 4   ;;  %s784_s10 = smov %s569_s11 }
 0x1ba   : > { %s785_s11 = smov %s657_s23  ;;  %s786_s12 = smov %s577_s13 }
 0x1bb   : > { %s787_s13 = smov %s789_s17  ;;  %20 = sbr.rel (!%p18_p12) target bundleno = 8 (0x8), region = 86 }
 0x1c0   :  { %272 = vsyncpa [#allocation3], 1 }
 0x1c1   :  { %274 = vsyncpa [#allocation3 + $0x1], 1 }
 0x1c2   :  { %275 = vsyncpa [#allocation6], 1 }
 0x1c3   :  { %277 = vsyncpa [#allocation6 + $0x1], 1 }
 0x1c4   :  { %278 = vsyncpa [#allocation4], 1 }
 0x1c5   :  { %280 = vsyncpa [#allocation4 + $0x1], 1 }

</bundles_post_ra>
